<compile_context>
chip_gen: v7x
topology: tpu7x:2x2x1
jax: 0.10.0
libtpu: 0.0.40
codegen_flags: <defaults>
</compile_context>

<pallas_src>
import jax
import jax.numpy as jnp
from jax.experimental import pallas as pl
from jax.experimental.pallas import tpu as pltpu


def _group_kernel(xyz_ref, neigh_ref, cent_ref):
    """Fused FPS + KNN + grouping for a block of `bb` batch elements.

    xyz_ref:   (bb, 8, N)    f32 channel-major points (rows 3..7 are zero padding)
    neigh_ref: (bb, 8, K*G)  f32 channel-major local coords, column index = k*G + g
    cent_ref:  (bb, 8, G)    f32 channel-major center coords
    """
    bb, _, N = xyz_ref.shape
    G = cent_ref.shape[2]
    KG = neigh_ref.shape[2]
    K = KG // G

    # Loop-invariant index helpers (hoisted out of the batch loop).
    lane_iota_1n = jax.lax.broadcasted_iota(jnp.int32, (1, N), 1)
    lane_iota_gn = jax.lax.broadcasted_iota(jnp.int32, (G, N), 1)
    g_iota = jax.lax.broadcasted_iota(jnp.int32, (8, G), 1)
    # Selector that tiles the (8, G) centers into (8, K*G) via a tiny matmul
    # (avoids lane-axis concatenation): g_sel[k*G+g, g'] = 1 iff g == g'.
    row_mod = jax.lax.broadcasted_iota(jnp.int32, (KG, G), 0) % G
    col_id = jax.lax.broadcasted_iota(jnp.int32, (KG, G), 1)
    g_sel = (row_mod == col_id).astype(jnp.float32)          # (K*G, G)
    big = jnp.float32(1e30)

    for b in range(bb):                                       # static batch block
        X = xyz_ref[b]                                        # (8, N)

        # ---------------- FPS (serial over G samples) -----------------------
        def coords_at(idx):                                   # (1,1) int -> (8,1)
            mask = lane_iota_1n == idx
            return jnp.sum(jnp.where(mask, X, 0.0), axis=1, keepdims=True)

        def dist_to(c):                                       # (8,1) -> (1,N) sq. dist
            d = X - c
            return jnp.sum(d * d, axis=0, keepdims=True)

        # Like pointnet2 furthest_point_sample: seed with point 0.
        idx0 = jnp.zeros((1, 1), jnp.int32)
        c0 = coords_at(idx0)
        centers0 = jnp.where(g_iota == 0, c0, jnp.zeros((8, G), jnp.float32))
        mindist0 = dist_to(c0)

        def fps_body(i, carry):
            mindist, centers = carry
            maxval = jnp.max(mindist, axis=1, keepdims=True)  # (1,1)
            idx = jnp.min(jnp.where(mindist == maxval, lane_iota_1n, N),
                          axis=1, keepdims=True)              # argmax, ties -> smallest
            c = coords_at(idx)                                # (8,1)
            centers = jnp.where(g_iota == i, c, centers)
            mindist = jnp.minimum(mindist, dist_to(c))
            return mindist, centers

        _, C_cg = jax.lax.fori_loop(1, G, fps_body, (mindist0, centers0))  # (8, G)

        # ---------------- KNN + gather (same kernel, no HBM round-trip) -----
        xn = jnp.sum(X * X, axis=0, keepdims=True)            # (1, N)
        # dots[g, n] = c_g . x_n  via MXU (lhs contracted on the channel axis).
        dots = jax.lax.dot_general(
            C_cg, X, dimension_numbers=(((0,), (0,)), ((), ())),
            preferred_element_type=jnp.float32)               # (G, N)
        # |c_g|^2 is constant per row -> irrelevant for per-row argmin, drop it.
        dist = xn - 2.0 * dots                                # (G, N)

        # Iterative k-smallest extraction; only the one-hot selections are kept,
        # the gather itself is done in ONE batched matmul below.
        # TODO(synk): for production group_size (K~32, G~128, N~2048) switch this
        # unrolled loop to lax.fori_loop with `dist` / the stacked one-hot kept in
        # VMEM scratch to bound vreg pressure.
        onehots = []
        for k in range(K):
            minval = jnp.min(dist, axis=1, keepdims=True)     # (G, 1)
            idx = jnp.min(jnp.where(dist == minval, lane_iota_gn, N),
                          axis=1, keepdims=True)              # ties -> smallest index
            sel = lane_iota_gn == idx                         # (G, N)
            onehots.append(sel.astype(jnp.float32))
            dist = jnp.where(sel, big, dist)                  # exclude for next round

        stacked = jnp.concatenate(onehots, axis=0)            # (K*G, N), row = k*G + g
        # Single batched gather: (8, N) x (K*G, N)^T -> (8, K*G)   (MXU)
        gathered = jax.lax.dot_general(
            X, stacked, dimension_numbers=(((1,), (1,)), ((), ())),
            preferred_element_type=jnp.float32)               # (8, K*G)
        # Tile centers to (8, K*G) with the selector matmul (MXU, lane-dense).
        cent_tiled = jax.lax.dot_general(
            C_cg, g_sel, dimension_numbers=(((1,), (1,)), ((), ())),
            preferred_element_type=jnp.float32)               # (8, K*G)

        neigh_ref[b] = gathered - cent_tiled                  # one full-width store
        cent_ref[b] = C_cg


def group_forward(xyz, num_group, group_size):
    """xyz: (B, N, 3) float32 -> (neighborhood (B, G, K, 3), center (B, G, 3))."""
    B, N, _ = xyz.shape
    G, K = num_group, group_size
    x = xyz.astype(jnp.float32)

    # Glue: channel-major, pad coord dim 3 -> 8 with zeros (zeros cancel everywhere).
    xyz_cn = jnp.pad(jnp.transpose(x, (0, 2, 1)), ((0, 0), (0, 5), (0, 0)))  # (B, 8, N)

    # Batch blocking: amortize per-grid-step overhead over several batch elements.
    bb = next(c for c in (8, 4, 2, 1) if B % c == 0)

    neigh_cm, cent_cm = pl.pallas_call(
        _group_kernel,
        out_shape=(jax.ShapeDtypeStruct((B, 8, K * G), jnp.float32),
                   jax.ShapeDtypeStruct((B, 8, G), jnp.float32)),
        grid=(B // bb,),
        in_specs=[pl.BlockSpec((bb, 8, N), lambda i: (i, 0, 0))],
        out_specs=(pl.BlockSpec((bb, 8, K * G), lambda i: (i, 0, 0)),
                   pl.BlockSpec((bb, 8, G), lambda i: (i, 0, 0))),
        compiler_params=pltpu.CompilerParams(
            dimension_semantics=("parallel",)),               # 2 TCs on v7x
    )(xyz_cn)

    # Back to the PyTorch layout in cheap XLA glue (column index was k*G + g).
    neighborhood = jnp.transpose(neigh_cm.reshape(B, 8, K, G), (0, 3, 2, 1))[..., :3]
    center = jnp.transpose(cent_cm, (0, 2, 1))[..., :3]       # (B, G, 3)
    return neighborhood, center


if __name__ == "__main__":
    key = jax.random.PRNGKey(0)
    B, N = 2, 128
    num_group, group_size = 8, 4                              # Group(num_group=8, group_size=4)
    xyz = jax.random.normal(key, (B, N, 3), dtype=jnp.float32)

    fwd = jax.jit(lambda p: group_forward(p, num_group, group_size))
    neighborhood, center = fwd(xyz)
    jax.block_until_ready((neighborhood, center))

    assert neighborhood.shape == (B, num_group, group_size, 3)
    assert center.shape == (B, num_group, 3)
    assert bool(jnp.all(jnp.isfinite(neighborhood))) and bool(jnp.all(jnp.isfinite(center)))
    # each center is itself a data point -> its nearest neighbor offset is exactly 0
    assert bool(jnp.allclose(jnp.min(jnp.sum(neighborhood**2, -1), axis=-1), 0.0, atol=1e-5))
    print("KERNEL_OK")
</pallas_src>

<mosaic_0001>
module attributes {stable_mosaic.version = 11 : i64} {
  func.func @_group_kernel(%arg0: i32, %arg1: memref<2x8x128xf32, #tpu.memory_space<vmem>>, %arg2: memref<2x8x32xf32, #tpu.memory_space<vmem>>, %arg3: memref<2x8x8xf32, #tpu.memory_space<vmem>>) attributes {dimension_semantics = [#tpu.dimension_semantics<parallel>], iteration_bounds = array<i64: 1>, scalar_prefetch = 0 : i64, scratch_operands = 0 : i64, tpu.core_type = #tpu.core_type<tc>, window_params = [{transform_indices = @transform_0, window_bounds = array<i64: 2, 8, 128>}, {transform_indices = @transform_1, window_bounds = array<i64: 2, 8, 32>}, {transform_indices = @transform_2, window_bounds = array<i64: 2, 8, 8>}]} {
    %0 = tpu.iota {dimensions = array<i32: 1>} : vector<1x128xi32>
    %1 = tpu.iota {dimensions = array<i32: 1>} : vector<8x128xi32>
    %2 = tpu.iota {dimensions = array<i32: 1>} : vector<8x8xi32>
    %3 = tpu.iota {dimensions = array<i32: 0>} : vector<32x8xi32>
    %c8_i32 = arith.constant 8 : i32
    %c0_i32 = arith.constant 0 : i32
    %4 = arith.cmpi eq, %c8_i32, %c0_i32 : i32
    %c1_i32 = arith.constant 1 : i32
    %5 = arith.select %4, %c1_i32, %c8_i32 : i32
    %6 = vector.broadcast %5 : i32 to vector<32x8xi32>
    %7 = arith.remsi %3, %6 : vector<32x8xi32>
    %c0_i32_0 = arith.constant 0 : i32
    %8 = vector.broadcast %c0_i32_0 : i32 to vector<32x8xi32>
    %9 = arith.cmpi ne, %7, %8 : vector<32x8xi32>
    %c0_i32_1 = arith.constant 0 : i32
    %10 = vector.broadcast %c0_i32_1 : i32 to vector<32x8xi32>
    %11 = arith.cmpi slt, %7, %10 : vector<32x8xi32>
    %c0_i32_2 = arith.constant 0 : i32
    %12 = arith.cmpi slt, %5, %c0_i32_2 : i32
    %13 = vector.broadcast %12 : i1 to vector<32x8xi1>
    %14 = vector.broadcast %13 : vector<32x8xi1> to vector<32x8xi1>
    %15 = arith.xori %11, %14 : vector<32x8xi1>
    %16 = arith.andi %15, %9 : vector<32x8xi1>
    %17 = vector.broadcast %5 : i32 to vector<32x8xi32>
    %18 = arith.addi %7, %17 : vector<32x8xi32>
    %19 = arith.select %16, %18, %7 : vector<32x8xi1>, vector<32x8xi32>
    %20 = tpu.iota {dimensions = array<i32: 1>} : vector<32x8xi32>
    %21 = arith.cmpi eq, %19, %20 : vector<32x8xi32>
    %22 = arith.extui %21 : vector<32x8xi1> to vector<32x8xi32>
    %23 = arith.sitofp %22 : vector<32x8xi32> to vector<32x8xf32>
    %c0 = arith.constant 0 : index
    %c0_3 = arith.constant 0 : index
    %c0_4 = arith.constant 0 : index
    %24 = vector.load %arg1[%c0, %c0_3, %c0_4] : memref<2x8x128xf32, #tpu.memory_space<vmem>>, vector<1x8x128xf32>
    %25 = vector.shape_cast %24 : vector<1x8x128xf32> to vector<8x128xf32>
    %c0_i32_5 = arith.constant 0 : i32
    %26 = vector.broadcast %c0_i32_5 : i32 to vector<1x1xi32>
    %27 = vector.broadcast %26 : vector<1x1xi32> to vector<1x128xi32>
    %28 = arith.cmpi eq, %0, %27 : vector<1x128xi32>
    %cst = arith.constant 0.000000e+00 : f32
    %29 = vector.shape_cast %28 : vector<1x128xi1> to vector<1x128xi1>
    %30 = vector.broadcast %29 : vector<1x128xi1> to vector<8x128xi1>
    %31 = vector.broadcast %cst : f32 to vector<8x128xf32>
    %32 = arith.select %30, %25, %31 : vector<8x128xi1>, vector<8x128xf32>
    %cst_6 = arith.constant dense<0.000000e+00> : vector<8xf32>
    %33 = vector.multi_reduction <add>, %32, %cst_6 [1] : vector<8x128xf32> to vector<8xf32>
    %34 = vector.shape_cast %33 : vector<8xf32> to vector<8x1xf32>
    %c0_i32_7 = arith.constant 0 : i32
    %35 = vector.broadcast %c0_i32_7 : i32 to vector<8x8xi32>
    %36 = arith.cmpi eq, %2, %35 : vector<8x8xi32>
    %cst_8 = arith.constant 0.000000e+00 : f32
    %37 = vector.broadcast %cst_8 : f32 to vector<8x8xf32>
    %38 = vector.shape_cast %34 : vector<8x1xf32> to vector<8x1xf32>
    %39 = vector.broadcast %38 : vector<8x1xf32> to vector<8x8xf32>
    %40 = arith.select %36, %39, %37 : vector<8x8xi1>, vector<8x8xf32>
    %41 = vector.broadcast %34 : vector<8x1xf32> to vector<8x128xf32>
    %42 = arith.subf %25, %41 : vector<8x128xf32>
    %43 = arith.mulf %42, %42 : vector<8x128xf32>
    %cst_9 = arith.constant dense<0.000000e+00> : vector<128xf32>
    %44 = vector.multi_reduction <add>, %43, %cst_9 [0] : vector<8x128xf32> to vector<128xf32>
    %45 = vector.shape_cast %44 : vector<128xf32> to vector<1x128xf32>
    %c1_i32_10 = arith.constant 1 : i32
    %c7_i32 = arith.constant 7 : i32
    %46 = arith.addi %c1_i32_10, %c7_i32 : i32
    %c1_i32_11 = arith.constant 1 : i32
    %47:2 = scf.for %arg4 = %c1_i32_10 to %46 step %c1_i32_11 iter_args(%arg5 = %45, %arg6 = %40) -> (vector<1x128xf32>, vector<8x8xf32>)  : i32 {
      %cst_76 = arith.constant dense<0xFF800000> : vector<1xf32>
      %216 = vector.multi_reduction <maximumf>, %arg5, %cst_76 [1] : vector<1x128xf32> to vector<1xf32>
      %217 = vector.shape_cast %216 : vector<1xf32> to vector<1x1xf32>
      %218 = vector.broadcast %217 : vector<1x1xf32> to vector<1x128xf32>
      %219 = arith.cmpf oeq, %arg5, %218 : vector<1x128xf32>
      %c128_i32_77 = arith.constant 128 : i32
      %220 = vector.broadcast %c128_i32_77 : i32 to vector<1x128xi32>
      %221 = arith.select %219, %0, %220 : vector<1x128xi1>, vector<1x128xi32>
      %cst_78 = arith.constant dense<2147483647> : vector<1xi32>
      %222 = vector.multi_reduction <minsi>, %221, %cst_78 [1] : vector<1x128xi32> to vector<1xi32>
      %223 = vector.shape_cast %222 : vector<1xi32> to vector<1x1xi32>
      %224 = vector.broadcast %223 : vector<1x1xi32> to vector<1x128xi32>
      %225 = arith.cmpi eq, %0, %224 : vector<1x128xi32>
      %cst_79 = arith.constant 0.000000e+00 : f32
      %226 = vector.shape_cast %225 : vector<1x128xi1> to vector<1x128xi1>
      %227 = vector.broadcast %226 : vector<1x128xi1> to vector<8x128xi1>
      %228 = vector.broadcast %cst_79 : f32 to vector<8x128xf32>
      %229 = arith.select %227, %25, %228 : vector<8x128xi1>, vector<8x128xf32>
      %cst_80 = arith.constant dense<0.000000e+00> : vector<8xf32>
      %230 = vector.multi_reduction <add>, %229, %cst_80 [1] : vector<8x128xf32> to vector<8xf32>
      %231 = vector.shape_cast %230 : vector<8xf32> to vector<8x1xf32>
      %232 = vector.broadcast %arg4 : i32 to vector<8x8xi32>
      %233 = arith.cmpi eq, %2, %232 : vector<8x8xi32>
      %234 = vector.shape_cast %231 : vector<8x1xf32> to vector<8x1xf32>
      %235 = vector.broadcast %234 : vector<8x1xf32> to vector<8x8xf32>
      %236 = arith.select %233, %235, %arg6 : vector<8x8xi1>, vector<8x8xf32>
      %237 = vector.broadcast %231 : vector<8x1xf32> to vector<8x128xf32>
      %238 = arith.subf %25, %237 : vector<8x128xf32>
      %239 = arith.mulf %238, %238 : vector<8x128xf32>
      %cst_81 = arith.constant dense<0.000000e+00> : vector<128xf32>
      %240 = vector.multi_reduction <add>, %239, %cst_81 [0] : vector<8x128xf32> to vector<128xf32>
      %241 = vector.shape_cast %240 : vector<128xf32> to vector<1x128xf32>
      %242 = arith.minimumf %arg5, %241 : vector<1x128xf32>
      scf.yield %242, %236 : vector<1x128xf32>, vector<8x8xf32>
    }
    %c7_i32_12 = arith.constant 7 : i32
    %48 = arith.mulf %25, %25 : vector<8x128xf32>
    %cst_13 = arith.constant dense<0.000000e+00> : vector<128xf32>
    %49 = vector.multi_reduction <add>, %48, %cst_13 [0] : vector<8x128xf32> to vector<128xf32>
    %50 = vector.shape_cast %49 : vector<128xf32> to vector<1x128xf32>
    %cst_14 = arith.constant dense<0.000000e+00> : vector<8x128xf32>
    %51 = tpu.matmul %47#1, %25, %cst_14 {dimension_numbers = #tpu.dot_dimension_numbers<[0], [0], [1], [1], [0, 1, 1, 1], [], []>} : vector<8x8xf32>, vector<8x128xf32>, vector<8x128xf32> -> vector<8x128xf32>
    %cst_15 = arith.constant 2.000000e+00 : f32
    %52 = vector.broadcast %cst_15 : f32 to vector<8x128xf32>
    %53 = arith.mulf %52, %51 : vector<8x128xf32>
    %54 = vector.broadcast %50 : vector<1x128xf32> to vector<8x128xf32>
    %55 = arith.subf %54, %53 : vector<8x128xf32>
    %cst_16 = arith.constant dense<0x7F800000> : vector<8xf32>
    %56 = vector.multi_reduction <minimumf>, %55, %cst_16 [1] : vector<8x128xf32> to vector<8xf32>
    %57 = vector.shape_cast %56 : vector<8xf32> to vector<8x1xf32>
    %58 = vector.broadcast %57 : vector<8x1xf32> to vector<8x128xf32>
    %59 = arith.cmpf oeq, %55, %58 : vector<8x128xf32>
    %c128_i32 = arith.constant 128 : i32
    %60 = vector.broadcast %c128_i32 : i32 to vector<8x128xi32>
    %61 = arith.select %59, %1, %60 : vector<8x128xi1>, vector<8x128xi32>
    %cst_17 = arith.constant dense<2147483647> : vector<8xi32>
    %62 = vector.multi_reduction <minsi>, %61, %cst_17 [1] : vector<8x128xi32> to vector<8xi32>
    %63 = vector.shape_cast %62 : vector<8xi32> to vector<8x1xi32>
    %64 = vector.broadcast %63 : vector<8x1xi32> to vector<8x128xi32>
    %65 = arith.cmpi eq, %1, %64 : vector<8x128xi32>
    %66 = arith.extui %65 : vector<8x128xi1> to vector<8x128xi32>
    %67 = arith.sitofp %66 : vector<8x128xi32> to vector<8x128xf32>
    %cst_18 = arith.constant 1.000000e+30 : f32
    %68 = vector.broadcast %cst_18 : f32 to vector<8x128xf32>
    %69 = arith.select %65, %68, %55 : vector<8x128xi1>, vector<8x128xf32>
    %cst_19 = arith.constant dense<0x7F800000> : vector<8xf32>
    %70 = vector.multi_reduction <minimumf>, %69, %cst_19 [1] : vector<8x128xf32> to vector<8xf32>
    %71 = vector.shape_cast %70 : vector<8xf32> to vector<8x1xf32>
    %72 = vector.broadcast %71 : vector<8x1xf32> to vector<8x128xf32>
    %73 = arith.cmpf oeq, %69, %72 : vector<8x128xf32>
    %c128_i32_20 = arith.constant 128 : i32
    %74 = vector.broadcast %c128_i32_20 : i32 to vector<8x128xi32>
    %75 = arith.select %73, %1, %74 : vector<8x128xi1>, vector<8x128xi32>
    %cst_21 = arith.constant dense<2147483647> : vector<8xi32>
    %76 = vector.multi_reduction <minsi>, %75, %cst_21 [1] : vector<8x128xi32> to vector<8xi32>
    %77 = vector.shape_cast %76 : vector<8xi32> to vector<8x1xi32>
    %78 = vector.broadcast %77 : vector<8x1xi32> to vector<8x128xi32>
    %79 = arith.cmpi eq, %1, %78 : vector<8x128xi32>
    %80 = arith.extui %79 : vector<8x128xi1> to vector<8x128xi32>
    %81 = arith.sitofp %80 : vector<8x128xi32> to vector<8x128xf32>
    %cst_22 = arith.constant 1.000000e+30 : f32
    %82 = vector.broadcast %cst_22 : f32 to vector<8x128xf32>
    %83 = arith.select %79, %82, %69 : vector<8x128xi1>, vector<8x128xf32>
    %cst_23 = arith.constant dense<0x7F800000> : vector<8xf32>
    %84 = vector.multi_reduction <minimumf>, %83, %cst_23 [1] : vector<8x128xf32> to vector<8xf32>
    %85 = vector.shape_cast %84 : vector<8xf32> to vector<8x1xf32>
    %86 = vector.broadcast %85 : vector<8x1xf32> to vector<8x128xf32>
    %87 = arith.cmpf oeq, %83, %86 : vector<8x128xf32>
    %c128_i32_24 = arith.constant 128 : i32
    %88 = vector.broadcast %c128_i32_24 : i32 to vector<8x128xi32>
    %89 = arith.select %87, %1, %88 : vector<8x128xi1>, vector<8x128xi32>
    %cst_25 = arith.constant dense<2147483647> : vector<8xi32>
    %90 = vector.multi_reduction <minsi>, %89, %cst_25 [1] : vector<8x128xi32> to vector<8xi32>
    %91 = vector.shape_cast %90 : vector<8xi32> to vector<8x1xi32>
    %92 = vector.broadcast %91 : vector<8x1xi32> to vector<8x128xi32>
    %93 = arith.cmpi eq, %1, %92 : vector<8x128xi32>
    %94 = arith.extui %93 : vector<8x128xi1> to vector<8x128xi32>
    %95 = arith.sitofp %94 : vector<8x128xi32> to vector<8x128xf32>
    %cst_26 = arith.constant 1.000000e+30 : f32
    %96 = vector.broadcast %cst_26 : f32 to vector<8x128xf32>
    %97 = arith.select %93, %96, %83 : vector<8x128xi1>, vector<8x128xf32>
    %cst_27 = arith.constant dense<0x7F800000> : vector<8xf32>
    %98 = vector.multi_reduction <minimumf>, %97, %cst_27 [1] : vector<8x128xf32> to vector<8xf32>
    %99 = vector.shape_cast %98 : vector<8xf32> to vector<8x1xf32>
    %100 = vector.broadcast %99 : vector<8x1xf32> to vector<8x128xf32>
    %101 = arith.cmpf oeq, %97, %100 : vector<8x128xf32>
    %c128_i32_28 = arith.constant 128 : i32
    %102 = vector.broadcast %c128_i32_28 : i32 to vector<8x128xi32>
    %103 = arith.select %101, %1, %102 : vector<8x128xi1>, vector<8x128xi32>
    %cst_29 = arith.constant dense<2147483647> : vector<8xi32>
    %104 = vector.multi_reduction <minsi>, %103, %cst_29 [1] : vector<8x128xi32> to vector<8xi32>
    %105 = vector.shape_cast %104 : vector<8xi32> to vector<8x1xi32>
    %106 = vector.broadcast %105 : vector<8x1xi32> to vector<8x128xi32>
    %107 = arith.cmpi eq, %1, %106 : vector<8x128xi32>
    %108 = arith.extui %107 : vector<8x128xi1> to vector<8x128xi32>
    %109 = arith.sitofp %108 : vector<8x128xi32> to vector<8x128xf32>
    %110 = tpu.concatenate %67, %81, %95, %109 in 0 : vector<8x128xf32>, vector<8x128xf32>, vector<8x128xf32>, vector<8x128xf32> -> vector<32x128xf32>
    %cst_30 = arith.constant dense<0.000000e+00> : vector<8x32xf32>
    %111 = tpu.matmul %25, %110, %cst_30 {dimension_numbers = #tpu.dot_dimension_numbers<[1], [1], [0], [0], [0, 0, 1, 0], [], []>} : vector<8x128xf32>, vector<32x128xf32>, vector<8x32xf32> -> vector<8x32xf32>
    %cst_31 = arith.constant dense<0.000000e+00> : vector<8x32xf32>
    %112 = tpu.matmul %47#1, %23, %cst_31 {dimension_numbers = #tpu.dot_dimension_numbers<[1], [1], [0], [0], [0, 0, 1, 0], [], []>} : vector<8x8xf32>, vector<32x8xf32>, vector<8x32xf32> -> vector<8x32xf32>
    %113 = arith.subf %111, %112 : vector<8x32xf32>
    %c0_32 = arith.constant 0 : index
    %c0_33 = arith.constant 0 : index
    %c0_34 = arith.constant 0 : index
    %114 = vector.load %arg2[%c0_32, %c0_33, %c0_34] : memref<2x8x32xf32, #tpu.memory_space<vmem>>, vector<1x8x32xf32>
    %115 = vector.shape_cast %114 : vector<1x8x32xf32> to vector<8x32xf32>
    %116 = vector.shape_cast %113 : vector<8x32xf32> to vector<1x8x32xf32>
    tpu.vector_store %arg2[%c0_32, %c0_33, %c0_34], %116 {strides = array<i32>} : memref<2x8x32xf32, #tpu.memory_space<vmem>>, vector<1x8x32xf32>,
    %c0_35 = arith.constant 0 : index
    %c0_36 = arith.constant 0 : index
    %c0_37 = arith.constant 0 : index
    %117 = vector.load %arg3[%c0_35, %c0_36, %c0_37] : memref<2x8x8xf32, #tpu.memory_space<vmem>>, vector<1x8x8xf32>
    %118 = vector.shape_cast %117 : vector<1x8x8xf32> to vector<8x8xf32>
    %119 = vector.shape_cast %47#1 : vector<8x8xf32> to vector<1x8x8xf32>
    tpu.vector_store %arg3[%c0_35, %c0_36, %c0_37], %119 {strides = array<i32>} : memref<2x8x8xf32, #tpu.memory_space<vmem>>, vector<1x8x8xf32>,
    %c1 = arith.constant 1 : index
    %c0_38 = arith.constant 0 : index
    %c0_39 = arith.constant 0 : index
    %120 = vector.load %arg1[%c1, %c0_38, %c0_39] : memref<2x8x128xf32, #tpu.memory_space<vmem>>, vector<1x8x128xf32>
    %121 = vector.shape_cast %120 : vector<1x8x128xf32> to vector<8x128xf32>
    %c0_i32_40 = arith.constant 0 : i32
    %122 = vector.broadcast %c0_i32_40 : i32 to vector<1x1xi32>
    %123 = vector.broadcast %122 : vector<1x1xi32> to vector<1x128xi32>
    %124 = arith.cmpi eq, %0, %123 : vector<1x128xi32>
    %cst_41 = arith.constant 0.000000e+00 : f32
    %125 = vector.shape_cast %124 : vector<1x128xi1> to vector<1x128xi1>
    %126 = vector.broadcast %125 : vector<1x128xi1> to vector<8x128xi1>
    %127 = vector.broadcast %cst_41 : f32 to vector<8x128xf32>
    %128 = arith.select %126, %121, %127 : vector<8x128xi1>, vector<8x128xf32>
    %cst_42 = arith.constant dense<0.000000e+00> : vector<8xf32>
    %129 = vector.multi_reduction <add>, %128, %cst_42 [1] : vector<8x128xf32> to vector<8xf32>
    %130 = vector.shape_cast %129 : vector<8xf32> to vector<8x1xf32>
    %c0_i32_43 = arith.constant 0 : i32
    %131 = vector.broadcast %c0_i32_43 : i32 to vector<8x8xi32>
    %132 = arith.cmpi eq, %2, %131 : vector<8x8xi32>
    %cst_44 = arith.constant 0.000000e+00 : f32
    %133 = vector.broadcast %cst_44 : f32 to vector<8x8xf32>
    %134 = vector.shape_cast %130 : vector<8x1xf32> to vector<8x1xf32>
    %135 = vector.broadcast %134 : vector<8x1xf32> to vector<8x8xf32>
    %136 = arith.select %132, %135, %133 : vector<8x8xi1>, vector<8x8xf32>
    %137 = vector.broadcast %130 : vector<8x1xf32> to vector<8x128xf32>
    %138 = arith.subf %121, %137 : vector<8x128xf32>
    %139 = arith.mulf %138, %138 : vector<8x128xf32>
    %cst_45 = arith.constant dense<0.000000e+00> : vector<128xf32>
    %140 = vector.multi_reduction <add>, %139, %cst_45 [0] : vector<8x128xf32> to vector<128xf32>
    %141 = vector.shape_cast %140 : vector<128xf32> to vector<1x128xf32>
    %c1_i32_46 = arith.constant 1 : i32
    %c7_i32_47 = arith.constant 7 : i32
    %142 = arith.addi %c1_i32_46, %c7_i32_47 : i32
    %c1_i32_48 = arith.constant 1 : i32
    %143:2 = scf.for %arg4 = %c1_i32_46 to %142 step %c1_i32_48 iter_args(%arg5 = %141, %arg6 = %136) -> (vector<1x128xf32>, vector<8x8xf32>)  : i32 {
      %cst_76 = arith.constant dense<0xFF800000> : vector<1xf32>
      %216 = vector.multi_reduction <maximumf>, %arg5, %cst_76 [1] : vector<1x128xf32> to vector<1xf32>
      %217 = vector.shape_cast %216 : vector<1xf32> to vector<1x1xf32>
      %218 = vector.broadcast %217 : vector<1x1xf32> to vector<1x128xf32>
      %219 = arith.cmpf oeq, %arg5, %218 : vector<1x128xf32>
      %c128_i32_77 = arith.constant 128 : i32
      %220 = vector.broadcast %c128_i32_77 : i32 to vector<1x128xi32>
      %221 = arith.select %219, %0, %220 : vector<1x128xi1>, vector<1x128xi32>
      %cst_78 = arith.constant dense<2147483647> : vector<1xi32>
      %222 = vector.multi_reduction <minsi>, %221, %cst_78 [1] : vector<1x128xi32> to vector<1xi32>
      %223 = vector.shape_cast %222 : vector<1xi32> to vector<1x1xi32>
      %224 = vector.broadcast %223 : vector<1x1xi32> to vector<1x128xi32>
      %225 = arith.cmpi eq, %0, %224 : vector<1x128xi32>
      %cst_79 = arith.constant 0.000000e+00 : f32
      %226 = vector.shape_cast %225 : vector<1x128xi1> to vector<1x128xi1>
      %227 = vector.broadcast %226 : vector<1x128xi1> to vector<8x128xi1>
      %228 = vector.broadcast %cst_79 : f32 to vector<8x128xf32>
      %229 = arith.select %227, %121, %228 : vector<8x128xi1>, vector<8x128xf32>
      %cst_80 = arith.constant dense<0.000000e+00> : vector<8xf32>
      %230 = vector.multi_reduction <add>, %229, %cst_80 [1] : vector<8x128xf32> to vector<8xf32>
      %231 = vector.shape_cast %230 : vector<8xf32> to vector<8x1xf32>
      %232 = vector.broadcast %arg4 : i32 to vector<8x8xi32>
      %233 = arith.cmpi eq, %2, %232 : vector<8x8xi32>
      %234 = vector.shape_cast %231 : vector<8x1xf32> to vector<8x1xf32>
      %235 = vector.broadcast %234 : vector<8x1xf32> to vector<8x8xf32>
      %236 = arith.select %233, %235, %arg6 : vector<8x8xi1>, vector<8x8xf32>
      %237 = vector.broadcast %231 : vector<8x1xf32> to vector<8x128xf32>
      %238 = arith.subf %121, %237 : vector<8x128xf32>
      %239 = arith.mulf %238, %238 : vector<8x128xf32>
      %cst_81 = arith.constant dense<0.000000e+00> : vector<128xf32>
      %240 = vector.multi_reduction <add>, %239, %cst_81 [0] : vector<8x128xf32> to vector<128xf32>
      %241 = vector.shape_cast %240 : vector<128xf32> to vector<1x128xf32>
      %242 = arith.minimumf %arg5, %241 : vector<1x128xf32>
      scf.yield %242, %236 : vector<1x128xf32>, vector<8x8xf32>
    }
    %c7_i32_49 = arith.constant 7 : i32
    %144 = arith.mulf %121, %121 : vector<8x128xf32>
    %cst_50 = arith.constant dense<0.000000e+00> : vector<128xf32>
    %145 = vector.multi_reduction <add>, %144, %cst_50 [0] : vector<8x128xf32> to vector<128xf32>
    %146 = vector.shape_cast %145 : vector<128xf32> to vector<1x128xf32>
    %cst_51 = arith.constant dense<0.000000e+00> : vector<8x128xf32>
    %147 = tpu.matmul %143#1, %121, %cst_51 {dimension_numbers = #tpu.dot_dimension_numbers<[0], [0], [1], [1], [0, 1, 1, 1], [], []>} : vector<8x8xf32>, vector<8x128xf32>, vector<8x128xf32> -> vector<8x128xf32>
    %cst_52 = arith.constant 2.000000e+00 : f32
    %148 = vector.broadcast %cst_52 : f32 to vector<8x128xf32>
    %149 = arith.mulf %148, %147 : vector<8x128xf32>
    %150 = vector.broadcast %146 : vector<1x128xf32> to vector<8x128xf32>
    %151 = arith.subf %150, %149 : vector<8x128xf32>
    %cst_53 = arith.constant dense<0x7F800000> : vector<8xf32>
    %152 = vector.multi_reduction <minimumf>, %151, %cst_53 [1] : vector<8x128xf32> to vector<8xf32>
    %153 = vector.shape_cast %152 : vector<8xf32> to vector<8x1xf32>
    %154 = vector.broadcast %153 : vector<8x1xf32> to vector<8x128xf32>
    %155 = arith.cmpf oeq, %151, %154 : vector<8x128xf32>
    %c128_i32_54 = arith.constant 128 : i32
    %156 = vector.broadcast %c128_i32_54 : i32 to vector<8x128xi32>
    %157 = arith.select %155, %1, %156 : vector<8x128xi1>, vector<8x128xi32>
    %cst_55 = arith.constant dense<2147483647> : vector<8xi32>
    %158 = vector.multi_reduction <minsi>, %157, %cst_55 [1] : vector<8x128xi32> to vector<8xi32>
    %159 = vector.shape_cast %158 : vector<8xi32> to vector<8x1xi32>
    %160 = vector.broadcast %159 : vector<8x1xi32> to vector<8x128xi32>
    %161 = arith.cmpi eq, %1, %160 : vector<8x128xi32>
    %162 = arith.extui %161 : vector<8x128xi1> to vector<8x128xi32>
    %163 = arith.sitofp %162 : vector<8x128xi32> to vector<8x128xf32>
    %cst_56 = arith.constant 1.000000e+30 : f32
    %164 = vector.broadcast %cst_56 : f32 to vector<8x128xf32>
    %165 = arith.select %161, %164, %151 : vector<8x128xi1>, vector<8x128xf32>
    %cst_57 = arith.constant dense<0x7F800000> : vector<8xf32>
    %166 = vector.multi_reduction <minimumf>, %165, %cst_57 [1] : vector<8x128xf32> to vector<8xf32>
    %167 = vector.shape_cast %166 : vector<8xf32> to vector<8x1xf32>
    %168 = vector.broadcast %167 : vector<8x1xf32> to vector<8x128xf32>
    %169 = arith.cmpf oeq, %165, %168 : vector<8x128xf32>
    %c128_i32_58 = arith.constant 128 : i32
    %170 = vector.broadcast %c128_i32_58 : i32 to vector<8x128xi32>
    %171 = arith.select %169, %1, %170 : vector<8x128xi1>, vector<8x128xi32>
    %cst_59 = arith.constant dense<2147483647> : vector<8xi32>
    %172 = vector.multi_reduction <minsi>, %171, %cst_59 [1] : vector<8x128xi32> to vector<8xi32>
    %173 = vector.shape_cast %172 : vector<8xi32> to vector<8x1xi32>
    %174 = vector.broadcast %173 : vector<8x1xi32> to vector<8x128xi32>
    %175 = arith.cmpi eq, %1, %174 : vector<8x128xi32>
    %176 = arith.extui %175 : vector<8x128xi1> to vector<8x128xi32>
    %177 = arith.sitofp %176 : vector<8x128xi32> to vector<8x128xf32>
    %cst_60 = arith.constant 1.000000e+30 : f32
    %178 = vector.broadcast %cst_60 : f32 to vector<8x128xf32>
    %179 = arith.select %175, %178, %165 : vector<8x128xi1>, vector<8x128xf32>
    %cst_61 = arith.constant dense<0x7F800000> : vector<8xf32>
    %180 = vector.multi_reduction <minimumf>, %179, %cst_61 [1] : vector<8x128xf32> to vector<8xf32>
    %181 = vector.shape_cast %180 : vector<8xf32> to vector<8x1xf32>
    %182 = vector.broadcast %181 : vector<8x1xf32> to vector<8x128xf32>
    %183 = arith.cmpf oeq, %179, %182 : vector<8x128xf32>
    %c128_i32_62 = arith.constant 128 : i32
    %184 = vector.broadcast %c128_i32_62 : i32 to vector<8x128xi32>
    %185 = arith.select %183, %1, %184 : vector<8x128xi1>, vector<8x128xi32>
    %cst_63 = arith.constant dense<2147483647> : vector<8xi32>
    %186 = vector.multi_reduction <minsi>, %185, %cst_63 [1] : vector<8x128xi32> to vector<8xi32>
    %187 = vector.shape_cast %186 : vector<8xi32> to vector<8x1xi32>
    %188 = vector.broadcast %187 : vector<8x1xi32> to vector<8x128xi32>
    %189 = arith.cmpi eq, %1, %188 : vector<8x128xi32>
    %190 = arith.extui %189 : vector<8x128xi1> to vector<8x128xi32>
    %191 = arith.sitofp %190 : vector<8x128xi32> to vector<8x128xf32>
    %cst_64 = arith.constant 1.000000e+30 : f32
    %192 = vector.broadcast %cst_64 : f32 to vector<8x128xf32>
    %193 = arith.select %189, %192, %179 : vector<8x128xi1>, vector<8x128xf32>
    %cst_65 = arith.constant dense<0x7F800000> : vector<8xf32>
    %194 = vector.multi_reduction <minimumf>, %193, %cst_65 [1] : vector<8x128xf32> to vector<8xf32>
    %195 = vector.shape_cast %194 : vector<8xf32> to vector<8x1xf32>
    %196 = vector.broadcast %195 : vector<8x1xf32> to vector<8x128xf32>
    %197 = arith.cmpf oeq, %193, %196 : vector<8x128xf32>
    %c128_i32_66 = arith.constant 128 : i32
    %198 = vector.broadcast %c128_i32_66 : i32 to vector<8x128xi32>
    %199 = arith.select %197, %1, %198 : vector<8x128xi1>, vector<8x128xi32>
    %cst_67 = arith.constant dense<2147483647> : vector<8xi32>
    %200 = vector.multi_reduction <minsi>, %199, %cst_67 [1] : vector<8x128xi32> to vector<8xi32>
    %201 = vector.shape_cast %200 : vector<8xi32> to vector<8x1xi32>
    %202 = vector.broadcast %201 : vector<8x1xi32> to vector<8x128xi32>
    %203 = arith.cmpi eq, %1, %202 : vector<8x128xi32>
    %204 = arith.extui %203 : vector<8x128xi1> to vector<8x128xi32>
    %205 = arith.sitofp %204 : vector<8x128xi32> to vector<8x128xf32>
    %206 = tpu.concatenate %163, %177, %191, %205 in 0 : vector<8x128xf32>, vector<8x128xf32>, vector<8x128xf32>, vector<8x128xf32> -> vector<32x128xf32>
    %cst_68 = arith.constant dense<0.000000e+00> : vector<8x32xf32>
    %207 = tpu.matmul %121, %206, %cst_68 {dimension_numbers = #tpu.dot_dimension_numbers<[1], [1], [0], [0], [0, 0, 1, 0], [], []>} : vector<8x128xf32>, vector<32x128xf32>, vector<8x32xf32> -> vector<8x32xf32>
    %cst_69 = arith.constant dense<0.000000e+00> : vector<8x32xf32>
    %208 = tpu.matmul %143#1, %23, %cst_69 {dimension_numbers = #tpu.dot_dimension_numbers<[1], [1], [0], [0], [0, 0, 1, 0], [], []>} : vector<8x8xf32>, vector<32x8xf32>, vector<8x32xf32> -> vector<8x32xf32>
    %209 = arith.subf %207, %208 : vector<8x32xf32>
    %c1_70 = arith.constant 1 : index
    %c0_71 = arith.constant 0 : index
    %c0_72 = arith.constant 0 : index
    %210 = vector.load %arg2[%c1_70, %c0_71, %c0_72] : memref<2x8x32xf32, #tpu.memory_space<vmem>>, vector<1x8x32xf32>
    %211 = vector.shape_cast %210 : vector<1x8x32xf32> to vector<8x32xf32>
    %212 = vector.shape_cast %209 : vector<8x32xf32> to vector<1x8x32xf32>
    tpu.vector_store %arg2[%c1_70, %c0_71, %c0_72], %212 {strides = array<i32>} : memref<2x8x32xf32, #tpu.memory_space<vmem>>, vector<1x8x32xf32>,
    %c1_73 = arith.constant 1 : index
    %c0_74 = arith.constant 0 : index
    %c0_75 = arith.constant 0 : index
    %213 = vector.load %arg3[%c1_73, %c0_74, %c0_75] : memref<2x8x8xf32, #tpu.memory_space<vmem>>, vector<1x8x8xf32>
    %214 = vector.shape_cast %213 : vector<1x8x8xf32> to vector<8x8xf32>
    %215 = vector.shape_cast %143#1 : vector<8x8xf32> to vector<1x8x8xf32>
    tpu.vector_store %arg3[%c1_73, %c0_74, %c0_75], %215 {strides = array<i32>} : memref<2x8x8xf32, #tpu.memory_space<vmem>>, vector<1x8x8xf32>,
    return
  }
  func.func @transform_0(%arg0: i32) -> (i32, i32, i32) {
    %c0_i32 = arith.constant 0 : i32
    %c0_i32_0 = arith.constant 0 : i32
    %c0_i32_1 = arith.constant 0 : i32
    return %arg0, %c0_i32, %c0_i32_0 : i32, i32, i32
  }
  func.func @transform_1(%arg0: i32) -> (i32, i32, i32) {
    %c0_i32 = arith.constant 0 : i32
    %c0_i32_0 = arith.constant 0 : i32
    %c0_i32_1 = arith.constant 0 : i32
    return %arg0, %c0_i32, %c0_i32_0 : i32, i32, i32
  }
  func.func @transform_2(%arg0: i32) -> (i32, i32, i32) {
    %c0_i32 = arith.constant 0 : i32
    %c0_i32_0 = arith.constant 0 : i32
    %c0_i32_1 = arith.constant 0 : i32
    return %arg0, %c0_i32, %c0_i32_0 : i32, i32, i32
  }
}

</mosaic_0001>

<bundles_post_ra>
// kernel: _lambda_.1
= control target key start
LH: loop header
LB: loop body
LE: loop exit
PB: predicated region body
PF: predicated region fallthrough
CT: control target
= control target key end

     0   :  { %v10_v0 = vlaneseq  ;;  %v1176_v11 = vmov 0.0   ;;  %s1225_s11 = smov 1   ;;  %s1382_s1 = inlined_call_operand.vmem [shape: f32[2,8,32], index: 1, kind: output, shape index: {0}]   ;;  %s1383_s2 = inlined_call_operand.vmem [shape: f32[2,8,8], index: 2, kind: output, shape index: {1}]   ;;  %s1384_s0 = inlined_call_operand.vmem [shape: f32[2,8,128], index: 0, kind: input, shape index: {}]  }
   0x1   :  { %v1200_v7 = vld [vmem:[%s1384_s0] sm:$0xff] }
   0x2   :  { %v1195_v1 = vand.u32 127, %v10_v0  ;;  %v13_v2 = vshrl.u32 %v10_v0, 7 }
   0x4   :  { %v14_v3 = vadd.s32 8, %v13_v2  ;;  %v15_v4 = vadd.s32 16, %v13_v2  ;;  %v16_v5 = vadd.s32 24, %v13_v2  ;;  %v21_v6 = vand.u32 7, %v13_v2 }
   0x5   :  { %vm78_vm0 = vcmp.eq.s32.totalorder %v1195_v1, 0 }
   0x6   :  { %v28_v8 = vand.u32 7, %v14_v3  ;;  %v35_v9 = vand.u32 7, %v15_v4  ;;  %v42_v10 = vand.u32 7, %v16_v5  ;;  %vm65_vm1 = vcmp.eq.s32.totalorder %v21_v6, %v1195_v1 }
   0x7   :  { %v1205_v12 = vsel %vm65_vm1, 1.0, %v1176_v11  ;;  %v81_v13 = vsel %vm78_vm0, %v1200_v7, 0.0 }
   0x8   :  { %vm66_vm2 = vcmp.eq.s32.totalorder %v28_v8, %v1195_v1  ;;  %vm67_vm3 = vcmp.eq.s32.totalorder %v35_v9, %v1195_v1  ;;  %vm68_vm4 = vcmp.eq.s32.totalorder %v42_v10, %v1195_v1  ;;  %82 = vadd.xlane.f32.xlu0 %v81_v13 }
   0x9   :  { %v1214_v14 = vsel %vm66_vm2, 1.0, %v1176_v11  ;;  %v1217_v15 = vsel %vm67_vm3, 1.0, %v1176_v11  ;;  %v1220_v16 = vsel %vm68_vm4, 1.0, %v1176_v11 }
  0x95   :  { %v83_v17 = vpop.xlane.xlu0 %82 }
  0x96   :  { %v84_v18 = vsel %vm78_vm0, %v83_v17, 0.0   ;;  %v85_v19 = vsub.f32 %v1200_v7, %v83_v17 }
  0x97   :  { %v1152_v27 = vmov %v84_v18  }
  0x98   :  { %v86_v20 = vmul.f32 %v85_v19, %v85_v19 }
  0x9a   :  { %v87_v21 = vrot.slane %v86_v20, 4 }
  0x9c   :  { %v88_v22 = vadd.f32 %v87_v21, %v86_v20 }
  0x9e   :  { %v89_v23 = vrot.slane %v88_v22, 2 }
  0xa0   :  { %v90_v24 = vadd.f32 %v89_v23, %v88_v22 }
  0xa2   :  { %v91_v25 = vrot.slane %v90_v24, 1 }
  0xa4   :  { %v92_v26 = vadd.f32 %v91_v25, %v90_v24  }
  0xa6   :  { %v1156_v28 = vmov %v92_v26  }
  0xa7 LB: > { %101 = vmax.xlane.f32.xlu0 %v1158_v28  ;;  %v125_v43 = vstv %s1162_s11  ;;  %s98_s11 = sadd.s32 1, %s1162_s11   ;;  %s1162_s11 = sphi %s1225_s11, %s98_s11   ;;  %v1158_v28 = vphi %v1156_v28, %v136_v28   ;;  %v1154_v27 = vphi %v1152_v27, %v1153_v27  }
  0xa8   : > { %vm126_vm8 = vcmp.eq.s32.totalorder %v1195_v1, %v125_v43  ;;  %p95_p0 = scmp.ge.s32.totalorder %s98_s11, 8  }
  0xa9   :  { %994 = vmatprep.subr.mxu0 (%p95_p0), %v1176_v11  ;;  %vm176_vm9 = vcmask (%p95_p0), 64512   ;;  %vm1177_vm10 = vmmov (%p95_p0), 0   ;;  %v137_v55 = vmul.f32 (%p95_p0), %v1200_v7, %v1200_v7  ;;  %s1319_s17 = smov (%p95_p0), 1  }
  0xaa   :  { %995 = vmatpush3.msra.mxu0 (%p95_p0), %v1200_v7  ;;  %996 = vmatprep.mubr.msk.f32.mxu0 (%p95_p0), %vm1177_vm10, %v1176_v11 }
  0xab   :  { %1007 = vmatprep.mubr.msk.f32.mxu1 (%p95_p0), %vm1177_vm10, %v1176_v11  ;;  %v138_v56 = vrot.slane (%p95_p0), %v137_v55, 4 }
  0xad   :  { %v139_v57 = vadd.f32 (%p95_p0), %v138_v56, %v137_v55 }
  0xaf   :  { %v140_v58 = vrot.slane (%p95_p0), %v139_v57, 2 }
  0xb1   :  { %v141_v59 = vadd.f32 (%p95_p0), %v140_v58, %v139_v57  ;;  %v1278_v58 = vpack.c.bf16 (%p95_p0), %v1214_v14, %v1205_v12  ;;  %v1292_v12 = vpack.c.bf16 (%p95_p0), %v1220_v16, %v1217_v15  ;;  %v1302_v14 = vld [vmem:[%s1384_s0 + $0x8] sm:$0xff] (%p95_p0) }
  0xb3   :  { %v142_v60 = vrot.slane (%p95_p0), %v141_v59, 1 }
  0xb5   :  { %v143_v61 = vadd.f32 (%p95_p0), %v142_v60, %v141_v59 }
 0x134   : > { %v102_v29 = vpop.xlane.xlu0 %101 }
 0x135   : > { %vm103_vm5 = vcmp.eq.f32.partialorder %v1158_v28, %v102_v29 }
 0x136   : > { %v104_v30 = vsel %vm103_vm5, %v1195_v1, 128 }
 0x137   : > { %v106_v31 = vshra.s32 %v104_v30, 16  ;;  %v105_v33 = vand.u32 65535, %v104_v30 }
 0x139   : > { %v108_v32 = vcvt.s32.f32 %v106_v31  ;;  %v107_v35 = vcvt.s32.f32 %v105_v33  ;;  %v1178_v31 = vmov (%p95_p0), 0.0|0.0  }
 0x13a   :  { %1048 = vmatprep.subr.bf16.mxu1 (%p95_p0), %v1178_v31  ;;  %1054 = vmatprep.subr.bf16.mxu0 (%p95_p0), %v1178_v31 }
 0x13b   : > { %109 = vmin.xlane.f32.xlu0 %v108_v32 }
 0x1c8   : > { %v110_v34 = vpop.xlane.xlu0 %109 }
 0x1c9   : > { %vm111_vm6 = vcmp.eq.f32.partialorder %v108_v32, %v110_v34  ;;  %v116_v37 = vcvt.f32.s32 %v110_v34 }
 0x1ca   : > { %v112_v36 = vsel %vm111_vm6, %v107_v35, inf }
 0x1cb   : > { %113 = vmin.xlane.f32.xlu1 %v112_v36  ;;  %v117_v39 = vshll.u32 %v116_v37, 16 }
 0x258   : > { %v114_v38 = vpop.xlane.xlu1 %113 }
 0x259   : > { %v115_v40 = vcvt.f32.s32 %v114_v38  ;;  %v1179_v38 = vmov (%p95_p0), 1.0|1.0  }
 0x25b   : > { %v118_v41 = vadd.s32 %v117_v39, %v115_v40 }
 0x25d   : > { %vm119_vm7 = vcmp.eq.s32.totalorder %v1195_v1, %v118_v41 }
 0x25e   : > { %v122_v42 = vsel %vm119_vm7, %v1200_v7, 0.0  ;;  %vm1282_vm7 = vmpackc.low (%p95_p0), %vm176_vm9, %vm176_vm9 }
 0x25f   : > { %123 = vadd.xlane.f32.xlu1 %v122_v42 }
 0x2ec   : > { %v124_v44 = vpop.xlane.xlu1 %123 }
 0x2ed   : > { %v1235_v27 = vsel %vm126_vm8, %v124_v44, %v1154_v27   ;;  %v128_v46 = vsub.f32 %v1200_v7, %v124_v44 }
 0x2ee   : > { %v1385_v45 = vmov %v1235_v27 }
 0x2ef   : > { %v129_v47 = vmul.f32 %v128_v46, %v128_v46  ;;  %v1153_v27 = vmov %v1385_v45   ;;  %144 = vxpose.xlu0.b32.start.end [1/1] (short) (narrow) (%p95_p0), %v1385_v45, 8  ;;  %497 = vst.msk [vmem:[%s1383_s2] sm:$0xff] (%p95_p0), %vm176_vm9, %v1385_v45 }
 0x2f1   : > { %v130_v48 = vrot.slane %v129_v47, 4 }
 0x2f3   : > { %v131_v49 = vadd.f32 %v130_v48, %v129_v47 }
 0x2f5   : > { %v132_v50 = vrot.slane %v131_v49, 2 }
 0x2f7   : > { %v133_v51 = vadd.f32 %v132_v50, %v131_v49  ;;  %97 = sbr.rel (!%p95_p0) target bundleno = 167 (0xa7), region = 49 }
 0x2f9   : > { %v134_v52 = vrot.slane %v133_v51, 1 }
 0x2fb   : > { %v135_v53 = vadd.f32 %v134_v52, %v133_v51 }
 0x2fd   : > { %v136_v28 = vmin.f32 %v1158_v28, %v135_v53  }
 0x36f   :  { %v160_v54 = vpop.trf.xlu0 }
 0x370   :  { %997 = vmatmul.mubr.msk.f32.vlgmr.msra.gmra.mrb[0].mxu0 %vm176_vm9, %v160_v54 }
 0x371   :  { %1018 = vmatprep.mubr.msk.f32.mxu0 %vm1177_vm10, %v1176_v11  ;;  %1057 = vmatpush3.bf16.xpose.msk.msra.mxu0 %vm1282_vm7, %v1278_v58 }
 0x372   :  { %1058 = vmatprep.subr.bf16.mxu0 %v1178_v31 }
 0x379   :  { %1061 = vmatpush3.bf16.xpose.msk.msra.mxu0 %vm1282_vm7, %v1292_v12 }
 0x380   :  { %1019 = vmatmul.mubr.msk.f32.vlgmr.msra.gmra.mrb[2].mxu0 %vm176_vm9, %v1385_v45 }
 0x443   :  { %v246_v62 = vpop.f32.mrb[0].mxu0 }
 0x444   :  { %v250_v63 = vmul.f32 2.0, %v246_v62  ;;  %v998_v0 = vpop.f32.mrb[1].mxu0 }
 0x445   :  { %v500_v0 = vsel %vm78_vm0, %v1302_v14, 0.0 }
 0x446   :  { %v251_v2 = vsub.f32 %v143_v61, %v250_v63 }
 0x448   :  { %252 = vmin.xlane.f32.xlu0 %v251_v2 }
 0x4d5   :  { %v253_v3 = vpop.xlane.xlu0 %252 }
 0x4d6   :  { %vm254_vm11 = vcmp.eq.f32.partialorder %v251_v2, %v253_v3 }
 0x4d7   :  { %v255_v4 = vsel %vm254_vm11, %v1195_v1, 128 }
 0x4d8   :  { %v257_v5 = vshra.s32 %v255_v4, 16  ;;  %v256_v8 = vand.u32 65535, %v255_v4 }
 0x4da   :  { %v259_v6 = vcvt.s32.f32 %v257_v5  ;;  %v258_v9 = vcvt.s32.f32 %v256_v8 }
 0x4dc   :  { %260 = vmin.xlane.f32.xlu1 %v259_v6 }
 0x569   :  { %v261_v10 = vpop.xlane.xlu1 %260 }
 0x56a   :  { %vm262_vm12 = vcmp.eq.f32.partialorder %v259_v6, %v261_v10  ;;  %v267_v17 = vcvt.f32.s32 %v261_v10 }
 0x56b   :  { %v263_v13 = vsel %vm262_vm12, %v258_v9, inf }
 0x56c   :  { %264 = vmin.xlane.f32.xlu1 %v263_v13  ;;  %v268_v19 = vshll.u32 %v267_v17, 16 }
 0x5f9   :  { %v265_v18 = vpop.xlane.xlu1 %264 }
 0x5fa   :  { %v266_v20 = vcvt.f32.s32 %v265_v18 }
 0x5fc   :  { %v269_v21 = vadd.s32 %v268_v19, %v266_v20  ;;  %v490_v20 = vpop.f32.mrb[2].mxu0 }
 0x5fe   :  { %vm270_vm13 = vcmp.eq.s32.totalorder %v1195_v1, %v269_v21  ;;  %v1020_v21 = vpop.f32.mrb[3].mxu0 }
 0x5ff   :  { %v273_v22 = vsel %vm270_vm13, 1e+30, %v251_v2 }
 0x600   :  { %274 = vmin.xlane.f32.xlu1 %v273_v22 }
 0x68d   :  { %v275_v23 = vpop.xlane.xlu1 %274 }
 0x68e   :  { %vm276_vm14 = vcmp.eq.f32.partialorder %v273_v22, %v275_v23 }
 0x68f   :  { %v277_v24 = vsel %vm276_vm14, %v1195_v1, 128 }
 0x690   :  { %v279_v25 = vshra.s32 %v277_v24, 16  ;;  %v278_v27 = vand.u32 65535, %v277_v24 }
 0x692   :  { %v281_v26 = vcvt.s32.f32 %v279_v25  ;;  %v280_v28 = vcvt.s32.f32 %v278_v27 }
 0x694   :  { %282 = vmin.xlane.f32.xlu1 %v281_v26 }
 0x721   :  { %v283_v29 = vpop.xlane.xlu1 %282 }
 0x722   :  { %vm284_vm15 = vcmp.eq.f32.partialorder %v281_v26, %v283_v29  ;;  %v289_v32 = vcvt.f32.s32 %v283_v29 }
 0x723   :  { %v285_v30 = vsel %vm284_vm15, %v280_v28, inf }
 0x724   :  { %286 = vmin.xlane.f32.xlu1 %v285_v30  ;;  %v290_v34 = vshll.u32 %v289_v32, 16 }
 0x7b1   :  { %v287_v33 = vpop.xlane.xlu1 %286 }
 0x7b2   :  { %v288_v35 = vcvt.f32.s32 %v287_v33 }
 0x7b4   :  { %v291_v36 = vadd.s32 %v290_v34, %v288_v35 }
 0x7b6   :  { %vm292_vm1 = vcmp.eq.s32.totalorder %v1195_v1, %v291_v36 }
 0x7b7   :  { %vm1049_vm2 = vmpackc.low %vm292_vm1, %vm270_vm13  ;;  %v295_v37 = vsel %vm292_vm1, 1e+30, %v273_v22  ;;  %vm495_vm13 = vcmask 261120  }
 0x7b8   :  { %1050 = vmatpush3.bf16.xpose.msk.msra.mxu1 %vm1049_vm2, %v1179_v38  ;;  %296 = vmin.xlane.f32.xlu1 %v295_v37 }
 0x7b9   :  { %1051 = vmatprep.subr.bf16.mxu1 %v1178_v31 }
 0x845   :  { %v297_v39 = vpop.xlane.xlu1 %296 }
 0x846   :  { %vm298_vm3 = vcmp.eq.f32.partialorder %v295_v37, %v297_v39 }
 0x847   :  { %v299_v40 = vsel %vm298_vm3, %v1195_v1, 128 }
 0x848   :  { %v301_v41 = vshra.s32 %v299_v40, 16  ;;  %v300_v43 = vand.u32 65535, %v299_v40 }
 0x84a   :  { %v303_v42 = vcvt.s32.f32 %v301_v41  ;;  %v302_v44 = vcvt.s32.f32 %v300_v43 }
 0x84c   :  { %304 = vmin.xlane.f32.xlu1 %v303_v42 }
 0x8d9   :  { %v305_v46 = vpop.xlane.xlu1 %304 }
 0x8da   :  { %vm306_vm4 = vcmp.eq.f32.partialorder %v303_v42, %v305_v46  ;;  %v311_v48 = vcvt.f32.s32 %v305_v46 }
 0x8db   :  { %v307_v47 = vsel %vm306_vm4, %v302_v44, inf }
 0x8dc   :  { %308 = vmin.xlane.f32.xlu1 %v307_v47  ;;  %v312_v50 = vshll.u32 %v311_v48, 16 }
 0x969   :  { %v309_v49 = vpop.xlane.xlu1 %308 }
 0x96a   :  { %v310_v51 = vcvt.f32.s32 %v309_v49 }
 0x96c   :  { %v313_v52 = vadd.s32 %v312_v50, %v310_v51 }
 0x96e   :  { %vm314_vm5 = vcmp.eq.s32.totalorder %v1195_v1, %v313_v52 }
 0x96f   :  { %v317_v53 = vsel %vm314_vm5, 1e+30, %v295_v37 }
 0x970   :  { %318 = vmin.xlane.f32.xlu1 %v317_v53 }
 0x9fd   :  { %v319_v54 = vpop.xlane.xlu1 %318 }
 0x9fe   :  { %vm320_vm6 = vcmp.eq.f32.partialorder %v317_v53, %v319_v54 }
 0x9ff   :  { %v321_v55 = vsel %vm320_vm6, %v1195_v1, 128 }
 0xa00   :  { %v323_v56 = vshra.s32 %v321_v55, 16  ;;  %v322_v60 = vand.u32 65535, %v321_v55 }
 0xa02   :  { %v325_v57 = vcvt.s32.f32 %v323_v56  ;;  %v324_v61 = vcvt.s32.f32 %v322_v60 }
 0xa04   :  { %326 = vmin.xlane.f32.xlu1 %v325_v57 }
 0xa91   :  { %v327_v62 = vpop.xlane.xlu1 %326 }
 0xa92   :  { %vm328_vm8 = vcmp.eq.f32.partialorder %v325_v57, %v327_v62  ;;  %v333_v2 = vcvt.f32.s32 %v327_v62 }
 0xa93   :  { %v329_v63 = vsel %vm328_vm8, %v324_v61, inf }
 0xa94   :  { %330 = vmin.xlane.f32.xlu1 %v329_v63  ;;  %v334_v16 = vshll.u32 %v333_v2, 16 }
 0xa98   :  { %501 = vadd.xlane.f32.xlu1 %v500_v0 }
 0xb21   :  { %v331_v15 = vpop.xlane.xlu1 %330 }
 0xb22   :  { %v332_v3 = vcvt.f32.s32 %v331_v15 }
 0xb24   :  { %v335_v4 = vadd.s32 %v334_v16, %v332_v3 }
 0xb25   :  { %v502_v45 = vpop.xlane.xlu1 %501 }
 0xb26   :  { %vm336_vm11 = vcmp.eq.s32.totalorder %v1195_v1, %v335_v4  ;;  %v503_v5 = vsel %vm78_vm0, %v502_v45, 0.0   ;;  %v504_v6 = vsub.f32 %v1302_v14, %v502_v45 }
 0xb27   :  { %vm1052_vm12 = vmpackc.low %vm336_vm11, %vm314_vm5 }
 0xb28   :  { %1053 = vmatpush3.bf16.xpose.msk.msra.mxu1 %vm1052_vm12, %v1179_v38  ;;  %v505_v8 = vmul.f32 %v504_v6, %v504_v6 }
 0xb2a   :  { %v506_v9 = vrot.slane %v505_v8, 4 }
 0xb2c   :  { %v507_v10 = vadd.f32 %v506_v9, %v505_v8 }
 0xb2e   :  { %v508_v13 = vrot.slane %v507_v10, 2 }
 0xb2f   :  { %1008 = vmatmul.mubr.f32.vlgmr.msra.gmra.mrb[0].mxu1 %v1200_v7  ;;  %v1164_v7 = vmov %v503_v5  }
 0xb30   :  { %v509_v17 = vadd.f32 %v508_v13, %v507_v10 }
 0xb32   :  { %v510_v18 = vrot.slane %v509_v17, 1 }
 0xb34   :  { %v511_v19 = vadd.f32 %v510_v18, %v509_v17  }
 0xb36   :  { %v1168_v25 = vmov %v511_v19  }
 0xc02   :  { %v405_v22 = vpop.f32.mrb[0].mxu1 }
 0xc03   :  { %v494_v23 = vsub.f32 %v405_v22, %v490_v20  ;;  %v1009_v24 = vpop.f32.mrb[1].mxu1 }
 0xc05   :  { %496 = vst.msk [vmem:[%s1382_s1] sm:$0xff] %vm495_vm13, %v494_v23 }
 0xc06 LB: > { %520 = vmax.xlane.f32.xlu0 %v1170_v25  ;;  %v544_v42 = vstv %s1174_s17  ;;  %s517_s17 = sadd.s32 1, %s1174_s17   ;;  %s1174_s17 = sphi %s1319_s17, %s517_s17   ;;  %v1170_v25 = vphi %v1168_v25, %v555_v25   ;;  %v1166_v7 = vphi %v1164_v7, %v1165_v7  }
 0xc07   : > { %vm545_vm1 = vcmp.eq.s32.totalorder %v1195_v1, %v544_v42  ;;  %p514_p1 = scmp.ge.s32.totalorder %s517_s17, 8  }
 0xc08   :  { %1021 = vmatprep.subr.mxu1 (%p514_p1), %v1176_v11  ;;  %1023 = vmatprep.mubr.msk.f32.mxu1 (%p514_p1), %vm1177_vm10, %v1176_v11  ;;  %v556_v55 = vmul.f32 (%p514_p1), %v1302_v14, %v1302_v14 }
 0xc09   :  { %1022 = vmatpush3.msra.mxu1 (%p514_p1), %v1302_v14  ;;  %1062 = vmatprep.subr.bf16.mxu0 (%p514_p1), %v1178_v31 }
 0xc0a   :  { %1068 = vmatprep.subr.bf16.mxu1 (%p514_p1), %v1178_v31  ;;  %1034 = vmatprep.mubr.msk.f32.mxu0 (%p514_p1), %vm1177_vm10, %v1176_v11  ;;  %v557_v56 = vrot.slane (%p514_p1), %v556_v55, 4 }
 0xc0c   :  { %v558_v57 = vadd.f32 (%p514_p1), %v557_v56, %v556_v55 }
 0xc0e   :  { %v559_v60 = vrot.slane (%p514_p1), %v558_v57, 2 }
 0xc10   :  { %v560_v61 = vadd.f32 (%p514_p1), %v559_v60, %v558_v57 }
 0xc12   :  { %v561_v62 = vrot.slane (%p514_p1), %v560_v61, 1 }
 0xc93   : > { %v521_v26 = vpop.xlane.xlu0 %520 }
 0xc94   : > { %vm522_vm0 = vcmp.eq.f32.partialorder %v1170_v25, %v521_v26 }
 0xc95   : > { %v523_v27 = vsel %vm522_vm0, %v1195_v1, 128 }
 0xc96   : > { %v525_v28 = vshra.s32 %v523_v27, 16  ;;  %v524_v30 = vand.u32 65535, %v523_v27 }
 0xc98   : > { %v527_v29 = vcvt.s32.f32 %v525_v28  ;;  %v526_v33 = vcvt.s32.f32 %v524_v30 }
 0xc9a   : > { %528 = vmin.xlane.f32.xlu0 %v527_v29 }
 0xd27   : > { %v529_v32 = vpop.xlane.xlu0 %528 }
 0xd28   : > { %vm530_vm14 = vcmp.eq.f32.partialorder %v527_v29, %v529_v32  ;;  %v535_v35 = vcvt.f32.s32 %v529_v32 }
 0xd29   : > { %v531_v34 = vsel %vm530_vm14, %v526_v33, inf }
 0xd2a   : > { %532 = vmin.xlane.f32.xlu1 %v531_v34  ;;  %v536_v37 = vshll.u32 %v535_v35, 16 }
 0xdb7   : > { %v533_v36 = vpop.xlane.xlu1 %532 }
 0xdb8   : > { %v534_v39 = vcvt.f32.s32 %v533_v36 }
 0xdba   : > { %v537_v40 = vadd.s32 %v536_v37, %v534_v39 }
 0xdbc   : > { %vm538_vm15 = vcmp.eq.s32.totalorder %v1195_v1, %v537_v40 }
 0xdbd   : > { %v541_v41 = vsel %vm538_vm15, %v1302_v14, 0.0 }
 0xdbe   : > { %542 = vadd.xlane.f32.xlu1 %v541_v41 }
 0xe4b   : > { %v543_v43 = vpop.xlane.xlu1 %542 }
 0xe4c   : > { %v546_v44 = vsel %vm545_vm1, %v543_v43, %v1166_v7   ;;  %v547_v46 = vsub.f32 %v1302_v14, %v543_v43 }
 0xe4d   : > { %v1165_v7 = vmov %v546_v44   ;;  %563 = vxpose.xlu0.b32.start.end [1/1] (short) (narrow) (%p514_p1), %v546_v44, 8  ;;  %969 = vst.msk [vmem:[%s1383_s2 + $0x8] sm:$0xff] (%p514_p1), %vm176_vm9, %v546_v44 }
 0xe4e   : > { %v548_v47 = vmul.f32 %v547_v46, %v547_v46 }
 0xe50   : > { %v549_v48 = vrot.slane %v548_v47, 4 }
 0xe52   : > { %v550_v49 = vadd.f32 %v549_v48, %v548_v47 }
 0xe54   : > { %v551_v50 = vrot.slane %v550_v49, 2 }
 0xe56   : > { %v552_v51 = vadd.f32 %v551_v50, %v550_v49  ;;  %516 = sbr.rel (!%p514_p1) target bundleno = 3078 (0xc06), region = 60 }
 0xe58   : > { %v553_v52 = vrot.slane %v552_v51, 1 }
 0xe5a   : > { %v554_v53 = vadd.f32 %v553_v52, %v552_v51 }
 0xe5c   : > { %v555_v25 = vmin.f32 %v1170_v25, %v554_v53  }
 0xecd   :  { %v579_v54 = vpop.trf.xlu0 }
 0xece   :  { %1024 = vmatmul.mubr.msk.f32.vlgmr.msra.gmra.mrb[2].mxu1 %vm176_vm9, %v579_v54 }
 0xecf   :  { %1071 = vmatpush3.bf16.xpose.msk.msra.mxu1 %vm1282_vm7, %v1278_v58  ;;  %1045 = vmatprep.mubr.msk.f32.mxu1 %vm1177_vm10, %v1176_v11  ;;  %v562_v58 = vadd.f32 %v561_v62, %v560_v61 }
 0xed0   :  { %1072 = vmatprep.subr.bf16.mxu1 %v1178_v31 }
 0xed7   :  { %1075 = vmatpush3.bf16.xpose.msk.msra.mxu1 %vm1282_vm7, %v1292_v12 }
 0xede   :  { %1046 = vmatmul.mubr.msk.f32.vlgmr.msra.gmra.mrb[4].mxu1 %vm176_vm9, %v546_v44 }
 0xfa1   :  { %v664_v63 = vpop.f32.mrb[2].mxu1 }
 0xfa2   :  { %v668_v0 = vmul.f32 2.0, %v664_v63  ;;  %v1025_v11 = vpop.f32.mrb[3].mxu1 }
 0xfa4   :  { %v669_v2 = vsub.f32 %v562_v58, %v668_v0 }
 0xfa6   :  { %670 = vmin.xlane.f32.xlu0 %v669_v2 }
 0xfb1   :  { %v896_v55 = vpop.f32.mrb[4].mxu1 }
 0xfb2   :  { %v1047_v56 = vpop.f32.mrb[5].mxu1 }
0x1033   :  { %v671_v15 = vpop.xlane.xlu0 %670 }
0x1034   :  { %vm672_vm10 = vcmp.eq.f32.partialorder %v669_v2, %v671_v15 }
0x1035   :  { %v673_v59 = vsel %vm672_vm10, %v1195_v1, 128 }
0x1036   :  { %v675_v12 = vshra.s32 %v673_v59, 16  ;;  %v674_v3 = vand.u32 65535, %v673_v59 }
0x1038   :  { %v677_v16 = vcvt.s32.f32 %v675_v12  ;;  %v676_v4 = vcvt.s32.f32 %v674_v3 }
0x103a   :  { %678 = vmin.xlane.f32.xlu1 %v677_v16 }
0x10c7   :  { %v679_v45 = vpop.xlane.xlu1 %678 }
0x10c8   :  { %vm680_vm9 = vcmp.eq.f32.partialorder %v677_v16, %v679_v45  ;;  %v685_v6 = vcvt.f32.s32 %v679_v45 }
0x10c9   :  { %v681_v5 = vsel %vm680_vm9, %v676_v4, inf }
0x10ca   :  { %682 = vmin.xlane.f32.xlu1 %v681_v5  ;;  %v686_v9 = vshll.u32 %v685_v6, 16 }
0x1157   :  { %v683_v8 = vpop.xlane.xlu1 %682 }
0x1158   :  { %v684_v10 = vcvt.f32.s32 %v683_v8 }
0x115a   :  { %v687_v13 = vadd.s32 %v686_v9, %v684_v10 }
0x115c   :  { %vm688_vm2 = vcmp.eq.s32.totalorder %v1195_v1, %v687_v13 }
0x115d   :  { %v691_v17 = vsel %vm688_vm2, 1e+30, %v669_v2 }
0x115e   :  { %692 = vmin.xlane.f32.xlu1 %v691_v17 }
0x11eb   :  { %v693_v18 = vpop.xlane.xlu1 %692 }
0x11ec   :  { %vm694_vm3 = vcmp.eq.f32.partialorder %v691_v17, %v693_v18 }
0x11ed   :  { %v695_v19 = vsel %vm694_vm3, %v1195_v1, 128 }
0x11ee   :  { %v697_v20 = vshra.s32 %v695_v19, 16  ;;  %v696_v22 = vand.u32 65535, %v695_v19 }
0x11f0   :  { %v699_v21 = vcvt.s32.f32 %v697_v20  ;;  %v698_v23 = vcvt.s32.f32 %v696_v22 }
0x11f2   :  { %700 = vmin.xlane.f32.xlu1 %v699_v21 }
0x127f   :  { %v701_v24 = vpop.xlane.xlu1 %700 }
0x1280   :  { %vm702_vm4 = vcmp.eq.f32.partialorder %v699_v21, %v701_v24  ;;  %v707_v25 = vcvt.f32.s32 %v701_v24 }
0x1281   :  { %v703_v7 = vsel %vm702_vm4, %v698_v23, inf }
0x1282   :  { %704 = vmin.xlane.f32.xlu1 %v703_v7  ;;  %v708_v27 = vshll.u32 %v707_v25, 16 }
0x130f   :  { %v705_v26 = vpop.xlane.xlu1 %704 }
0x1310   :  { %v706_v28 = vcvt.f32.s32 %v705_v26 }
0x1312   :  { %v709_v29 = vadd.s32 %v708_v27, %v706_v28 }
0x1314   :  { %vm710_vm5 = vcmp.eq.s32.totalorder %v1195_v1, %v709_v29 }
0x1315   :  { %vm1063_vm6 = vmpackc.low %vm710_vm5, %vm688_vm2  ;;  %v713_v30 = vsel %vm710_vm5, 1e+30, %v691_v17 }
0x1316   :  { %1064 = vmatpush3.bf16.xpose.msk.msra.mxu0 %vm1063_vm6, %v1179_v38  ;;  %714 = vmin.xlane.f32.xlu1 %v713_v30 }
0x1317   :  { %1065 = vmatprep.subr.bf16.mxu0 %v1178_v31 }
0x13a3   :  { %v715_v32 = vpop.xlane.xlu1 %714 }
0x13a4   :  { %vm716_vm7 = vcmp.eq.f32.partialorder %v713_v30, %v715_v32 }
0x13a5   :  { %v717_v33 = vsel %vm716_vm7, %v1195_v1, 128 }
0x13a6   :  { %v719_v34 = vshra.s32 %v717_v33, 16  ;;  %v718_v36 = vand.u32 65535, %v717_v33 }
0x13a8   :  { %v721_v35 = vcvt.s32.f32 %v719_v34  ;;  %v720_v37 = vcvt.s32.f32 %v718_v36 }
0x13aa   :  { %722 = vmin.xlane.f32.xlu1 %v721_v35 }
0x1437   :  { %v723_v39 = vpop.xlane.xlu1 %722 }
0x1438   :  { %vm724_vm8 = vcmp.eq.f32.partialorder %v721_v35, %v723_v39  ;;  %v729_v41 = vcvt.f32.s32 %v723_v39 }
0x1439   :  { %v725_v40 = vsel %vm724_vm8, %v720_v37, inf }
0x143a   :  { %726 = vmin.xlane.f32.xlu1 %v725_v40  ;;  %v730_v43 = vshll.u32 %v729_v41, 16 }
0x14c7   :  { %v727_v42 = vpop.xlane.xlu1 %726 }
0x14c8   :  { %v728_v44 = vcvt.f32.s32 %v727_v42 }
0x14ca   :  { %v731_v46 = vadd.s32 %v730_v43, %v728_v44 }
0x14cc   :  { %vm732_vm11 = vcmp.eq.s32.totalorder %v1195_v1, %v731_v46 }
0x14cd   :  { %v735_v31 = vsel %vm732_vm11, 1e+30, %v713_v30 }
0x14ce   :  { %736 = vmin.xlane.f32.xlu1 %v735_v31 }
0x155b   :  { %v737_v47 = vpop.xlane.xlu1 %736 }
0x155c   :  { %vm738_vm12 = vcmp.eq.f32.partialorder %v735_v31, %v737_v47 }
0x155d   :  { %v739_v48 = vsel %vm738_vm12, %v1195_v1, 128 }
0x155e   :  { %v741_v49 = vshra.s32 %v739_v48, 16  ;;  %v740_v51 = vand.u32 65535, %v739_v48 }
0x1560   :  { %v743_v50 = vcvt.s32.f32 %v741_v49  ;;  %v742_v52 = vcvt.s32.f32 %v740_v51 }
0x1562   :  { %744 = vmin.xlane.f32.xlu1 %v743_v50 }
0x15ef   :  { %v745_v53 = vpop.xlane.xlu1 %744 }
0x15f0   :  { %vm746_vm0 = vcmp.eq.f32.partialorder %v743_v50, %v745_v53  ;;  %v751_v57 = vcvt.f32.s32 %v745_v53 }
0x15f1   :  { %v747_v54 = vsel %vm746_vm0, %v742_v52, inf }
0x15f2   :  { %748 = vmin.xlane.f32.xlu1 %v747_v54  ;;  %v752_v61 = vshll.u32 %v751_v57, 16 }
0x167f   :  { %v749_v60 = vpop.xlane.xlu1 %748 }
0x1680   :  { %v750_v62 = vcvt.f32.s32 %v749_v60 }
0x1682   :  { %v753_v58 = vadd.s32 %v752_v61, %v750_v62 }
0x1684   :  { %vm754_vm14 = vcmp.eq.s32.totalorder %v1195_v1, %v753_v58 }
0x1685   :  { %vm1066_vm15 = vmpackc.low %vm754_vm14, %vm732_vm11 }
0x1686   :  { %1067 = vmatpush3.bf16.xpose.msk.msra.mxu0 %vm1066_vm15, %v1179_v38 }
0x168d   :  { %1035 = vmatmul.mubr.f32.vlgmr.msra.gmra.mrb[4].mxu0 %v1302_v14 }
0x1760   :  { %v823_v63 = vpop.f32.mrb[4].mxu0 }
0x1761   :  { %v900_v0 = vsub.f32 %v823_v63, %v896_v55  ;;  %v1036_v11 = vpop.f32.mrb[5].mxu0 }
0x1763   :  { %968 = vst.msk [vmem:[%s1382_s1 + $0x8] sm:$0xff] %vm495_vm13, %v900_v0 }

</bundles_post_ra>
